<compile_context>
chip_gen: v7x
topology: tpu7x:2x2x1
jax: 0.10.0
libtpu: 0.0.40
codegen_flags: <defaults>
</compile_context>

<pallas_src>
import jax
import jax.numpy as jnp
from jax.experimental import pallas as pl
from jax.experimental.pallas import tpu as pltpu  # noqa: F401  (kept for TPU-specific tuning hooks)


def conv_unit_kernel(x_ref, w_ref, o_ref):
    # x_ref: (4, L)  rows = [tap0, tap+W, tap+2W, ones]  (L = lane-dense, mult. of 128)
    # w_ref: (F, 4)  columns = [w0, w1, w2, bias]
    # o_ref: (F, L)  lane-dense output slab (batch folded into lanes)
    out = jnp.dot(w_ref[...], x_ref[...],
                  preferred_element_type=jnp.float32)      # MXU: (F,4)@(4,L), bias folded in
    o_ref[...] = jnp.maximum(out, 0.0).astype(o_ref.dtype)  # VPU ReLU + unmasked stores


def conv_unit_forward(x_nchw, weight, bias):
    """x_nchw: (N, 1, H, W) float32; weight: (F, 3); bias: (F,)."""
    N, C, H, W = x_nchw.shape
    assert C == 1, "ConvUnit expects a single input channel"
    assert H >= 3, "kernel (3,1) needs H >= 3"
    F = weight.shape[0]
    Hout = H - 2                       # kernel (3,1), no padding, stride 1

    NHW = N * H * W
    L = ((NHW + 127) // 128) * 128     # lane-dense, multiple of 128 (512 here: no pad)

    # Flatten batch+spatial into one lane axis; pad (if needed) to a 128-multiple.
    flat = x_nchw[:, 0, :, :].reshape(NHW)
    if L != NHW:
        flat = jnp.pad(flat, (0, L - NHW))

    # Vertical stencil taps as lane rolls of the flat array.  For every VALID
    # output position p = n*H*W + i*W + j (i < Hout), p + t*W stays inside the
    # same batch element, so wrap-around / padding only lands in output rows
    # >= Hout, which are sliced off below.  4th row of ones folds the bias in.
    x_taps = jnp.stack(
        [flat, jnp.roll(flat, -W), jnp.roll(flat, -2 * W), jnp.ones_like(flat)],
        axis=0,
    )                                   # (4, L)
    w4 = jnp.concatenate([weight, bias.reshape(F, 1)], axis=1)  # (F, 4)

    # Whole problem (~110 KiB) fits trivially in VMEM on v5e/v6e/v7x, so use a
    # single grid-less pallas_call: full arrays DMA'd to VMEM once, one kernel
    # invocation, zero per-step pipeline overhead and no megacore scheduling.
    out_flat = pl.pallas_call(
        conv_unit_kernel,
        out_shape=jax.ShapeDtypeStruct((F, L), x_nchw.dtype),
    )(x_taps, w4)

    # Layout plumbing back to NCHW: drop lane padding, un-flatten, drop the
    # wrapped/garbage rows >= Hout.
    out = out_flat[:, :NHW].reshape(F, N, H, W)
    out = jnp.transpose(out, (1, 0, 2, 3))[:, :, :Hout, :]     # (N, F, Hout, W)
    return out


def make_params(num_filters=50, key=jax.random.PRNGKey(0)):
    # Weights exactly as in the PyTorch __init__:
    #   num_filters copies of [0.1, 0.1, -0.1], viewed as (F, 1, 3, 1).
    w = jnp.tile(jnp.array([0.1, 0.1, -0.1], dtype=jnp.float32),
                 (num_filters,)).reshape(num_filters, 1, 3, 1)
    # Bias: PyTorch default Conv2d bias init is U(-1/sqrt(fan_in), 1/sqrt(fan_in)),
    # fan_in = 1*3*1 = 3.  Initialized deterministically in-script (PyTorch-like,
    # not bit-identical to a given torch run).
    bound = 1.0 / jnp.sqrt(3.0)
    b = jax.random.uniform(key, (num_filters,), dtype=jnp.float32,
                           minval=-bound, maxval=bound)
    return w, b


def reference_forward(x_nchw, weight4, bias):
    # Plain-JAX reference of relu(conv2d(x, w(3,1)) + b) for validation.
    x = x_nchw[:, 0, :, :]                         # (N, H, W)
    w = weight4[:, 0, :, 0]                        # (F, 3)
    Hout = x.shape[1] - 2
    x0 = x[:, 0:Hout, :]
    x1 = x[:, 1:Hout + 1, :]
    x2 = x[:, 2:Hout + 2, :]
    out = (w[None, :, 0, None, None] * x0[:, None]
           + w[None, :, 1, None, None] * x1[:, None]
           + w[None, :, 2, None, None] * x2[:, None]
           + bias[None, :, None, None])
    return jnp.maximum(out, 0.0)


if __name__ == "__main__":
    key = jax.random.PRNGKey(0)
    kx, kb = jax.random.split(key)

    num_filters = 50
    N, C, H, W = 2, 1, 16, 16                      # small NCHW input (1 channel per module spec)
    x = jax.random.normal(kx, (N, C, H, W), dtype=jnp.float32)

    weight4, bias = make_params(num_filters, kb)   # (F,1,3,1), (F,)
    weight = weight4[:, 0, :, 0]                   # (F, 3) fed to the kernel

    out = conv_unit_forward(x, weight, bias)
    out = jax.block_until_ready(out)

    ref = reference_forward(x, weight4, bias)
    assert out.shape == (N, num_filters, H - 2, W)
    assert jnp.allclose(out, ref, atol=1e-5, rtol=1e-5)

    print("KERNEL_OK")
</pallas_src>

<mosaic_0001>
module attributes {stable_mosaic.version = 11 : i64} {
  func.func @conv_unit_kernel(%arg0: memref<4x512xf32, #tpu.memory_space<vmem>>, %arg1: memref<50x4xf32, #tpu.memory_space<vmem>>, %arg2: memref<50x512xf32, #tpu.memory_space<vmem>>) attributes {dimension_semantics = [], scalar_prefetch = 0 : i64, scratch_operands = 0 : i64, tpu.core_type = #tpu.core_type<tc>} {
    %c0 = arith.constant 0 : index
    %c0_0 = arith.constant 0 : index
    %0 = vector.load %arg1[%c0, %c0_0] : memref<50x4xf32, #tpu.memory_space<vmem>>, vector<50x4xf32>
    %c0_1 = arith.constant 0 : index
    %c0_2 = arith.constant 0 : index
    %1 = vector.load %arg0[%c0_1, %c0_2] : memref<4x512xf32, #tpu.memory_space<vmem>>, vector<4x512xf32>
    %cst = arith.constant dense<0.000000e+00> : vector<50x512xf32>
    %2 = tpu.matmul %0, %1, %cst {dimension_numbers = #tpu.dot_dimension_numbers<[1], [0], [0], [1], [0, 0, 1, 1], [], []>} : vector<50x4xf32>, vector<4x512xf32>, vector<50x512xf32> -> vector<50x512xf32>
    %cst_3 = arith.constant 0.000000e+00 : f32
    %3 = vector.broadcast %cst_3 : f32 to vector<50x512xf32>
    %4 = arith.maximumf %2, %3 : vector<50x512xf32>
    %c0_4 = arith.constant 0 : index
    %c0_5 = arith.constant 0 : index
    %5 = vector.load %arg2[%c0_4, %c0_5] : memref<50x512xf32, #tpu.memory_space<vmem>>, vector<50x512xf32>
    tpu.vector_store %arg2[%c0_4, %c0_5], %4 {strides = array<i32>} : memref<50x512xf32, #tpu.memory_space<vmem>>, vector<50x512xf32>,
    return
  }
}

</mosaic_0001>

<bundles_post_ra>
// kernel: tpu_custom_call.1
= control target key start
LH: loop header
LB: loop body
LE: loop exit
PB: predicated region body
PF: predicated region fallthrough
CT: control target
= control target key end

     0   :  { %vm47_vm0 = vcmask 1043456   ;;  %v390_v4 = vmov 0.0   ;;  %vm25_vm1 = vcmask 31744   ;;  %s462_s0 = inlined_call_operand.vmem [shape: f32[4,512], index: 0, kind: input, shape index: {}]   ;;  %s463_s1 = inlined_call_operand.vmem [shape: f32[50,4], index: 1, kind: input, shape index: {}]   ;;  %s464_s2 = inlined_call_operand.hbm [shape: f32[50,512], index: 2, kind: output, shape index: {}]  }
   0x1   :  { %v19_v0 = vld [vmem:[%s462_s0] sm:$0xff]  ;;  %v20_v1 = vld [vmem:[%s462_s0 + $0x8] sm:$0xff]  ;;  %120 = vmatprep.mubr.f32.mxu0 %v390_v4  ;;  %227 = vmatprep.mubr.f32.mxu1 %v390_v4 }
   0x2   :  { %v23_v2 = vcombine.high %v19_v0, %v19_v0  ;;  %v24_v3 = vcombine.high %v20_v1, %v20_v1  ;;  %v12_v5 = vld [vmem:[%s463_s1] sm:$0xff] }
   0x4   :  { %342 = vmatprep.subr.msk.mxu0 %vm47_vm0, %v23_v2  ;;  %351 = vmatprep.subr.msk.mxu1 %vm47_vm0, %v24_v3 }
   0x5   :  { %7 = vsyncpa [#allocation3], 0  ;;  %343 = vmatpush1.msk.msra.mxu0 %vm47_vm0, %v19_v0  ;;  %352 = vmatpush1.msk.msra.mxu1 %vm47_vm0, %v20_v1  ;;  %v13_v6 = vld [vmem:[%s463_s1 + $0x8] sm:$0xff]  ;;  %v14_v7 = vld [vmem:[%s463_s1 + $0x10] sm:$0xff] }
   0x6   :  { %344 = vmatmul.mubr.msk.f32.vlgmr.msra.gmra.mrb[0].mxu0 %vm25_vm1, %v12_v5  ;;  %353 = vmatmul.mubr.msk.f32.vlgmr.msra.gmra.mrb[0].mxu1 %vm25_vm1, %v12_v5  ;;  %v15_v8 = vld [vmem:[%s463_s1 + $0x18] sm:$0xff]  ;;  %v16_v9 = vld [vmem:[%s463_s1 + $0x20] sm:$0xff]  ;;  %v17_v10 = vld [vmem:[%s463_s1 + $0x28] sm:$0xff] }
   0x7   :  { %126 = vmatprep.mubr.f32.mxu0 %v390_v4  ;;  %233 = vmatprep.mubr.f32.mxu1 %v390_v4  ;;  %v18_v11 = vld [vmem:[%s463_s1 + $0x30] sm:$0x3]  ;;  %s391_s1 = smov [#allocation2]  }
   0x8   :  { %s331_s26 = sshll.u32 %s391_s1, 4  ;;  %s332_s26 = int_to_ptr.vmem [resolvable:$true] %s331_s26 }
   0x9   :  { %s366_s27 = scalar_lea.vmem %s332_s26, 3584  ;;  %p371_p1 = scmp.lt.s32.totalorder %s332_s26, %s332_s26 }
   0xa   :  { %345 = vmatmul.mubr.msk.f32.gmra.mrb[2].mxu0 %vm25_vm1, %v13_v6  ;;  %354 = vmatmul.mubr.msk.f32.gmra.mrb[2].mxu1 %vm25_vm1, %v13_v6  ;;  %p367_p0 = scmp.ne.s32.totalorder %s332_s26, %s366_s27  ;;  %p372_p2 = scmp.lt.s32.totalorder %s366_s27, %s366_s27 }
   0xb   :  { %132 = vmatprep.mubr.f32.mxu0 %v390_v4  ;;  %239 = vmatprep.mubr.f32.mxu1 %v390_v4 }
   0xc   :  { %p373_p3 = por %p372_p2, %p371_p1 }
   0xe   :  { %346 = vmatmul.mubr.msk.f32.gmra.mrb[4].mxu0 %vm25_vm1, %v14_v7  ;;  %355 = vmatmul.mubr.msk.f32.gmra.mrb[4].mxu1 %vm25_vm1, %v14_v7  ;;  %p374_p4 = pnand %p373_p3, %p367_p0 }
   0xf   :  { %138 = vmatprep.mubr.f32.mxu0 %v390_v4  ;;  %245 = vmatprep.mubr.f32.mxu1 %v390_v4 }
  0x12   :  { %347 = vmatmul.mubr.msk.f32.gmra.mrb[6].mxu0 %vm25_vm1, %v15_v8  ;;  %356 = vmatmul.mubr.msk.f32.gmra.mrb[6].mxu1 %vm25_vm1, %v15_v8 }
  0x13   :  { %144 = vmatprep.mubr.f32.mxu0 %v390_v4  ;;  %251 = vmatprep.mubr.f32.mxu1 %v390_v4 }
  0x16   :  { %348 = vmatmul.mubr.msk.f32.gmra.mrb[8].mxu0 %vm25_vm1, %v16_v9  ;;  %357 = vmatmul.mubr.msk.f32.gmra.mrb[8].mxu1 %vm25_vm1, %v16_v9 }
  0x17   :  { %150 = vmatprep.mubr.f32.mxu0 %v390_v4  ;;  %257 = vmatprep.mubr.f32.mxu1 %v390_v4 }
  0x1a   :  { %349 = vmatmul.mubr.msk.f32.gmra.mrb[10].mxu0 %vm25_vm1, %v17_v10  ;;  %358 = vmatmul.mubr.msk.f32.gmra.mrb[10].mxu1 %vm25_vm1, %v17_v10 }
  0x1b   :  { %156 = vmatprep.mubr.f32.mxu0 %v390_v4  ;;  %263 = vmatprep.mubr.f32.mxu1 %v390_v4 }
  0x1e   :  { %350 = vmatmul.mubr.msk.f32.gmra.mrb[12].mxu0 %vm25_vm1, %v18_v11  ;;  %359 = vmatmul.mubr.msk.f32.gmra.mrb[12].mxu1 %vm25_vm1, %v18_v11 }
  0xd9   :  { %v122_v12 = vpop.f32.mrb[0].mxu0  ;;  %v229_v13 = vpop.f32.mrb[0].mxu1 }
  0xda   :  { %v270_v14 = vmax.f32 %v122_v12, 0.0  ;;  %v272_v15 = vmax.f32 %v229_v13, 0.0  ;;  %v124_v16 = vpop.f32.mrb[1].mxu0  ;;  %v231_v17 = vpop.f32.mrb[1].mxu1 }
  0xdb   :  { %v271_v18 = vmax.f32 %v124_v16, 0.0  ;;  %v273_v19 = vmax.f32 %v231_v17, 0.0 }
  0xdc   :  { %298 = vst [vmem:[#allocation2] sm:$0xff] %v270_v14  ;;  %300 = vst [vmem:[#allocation2 + $0x10] sm:$0xff] %v272_v15 }
  0xdd   :  { %299 = vst [vmem:[#allocation2 + $0x8] sm:$0xff] %v271_v18  ;;  %301 = vst [vmem:[#allocation2 + $0x18] sm:$0xff] %v273_v19  ;;  %v128_v20 = vpop.f32.mrb[2].mxu0  ;;  %v235_v21 = vpop.f32.mrb[2].mxu1 }
  0xde   :  { %v274_v22 = vmax.f32 %v128_v20, 0.0  ;;  %v276_v23 = vmax.f32 %v235_v21, 0.0  ;;  %v130_v24 = vpop.f32.mrb[3].mxu0  ;;  %v237_v25 = vpop.f32.mrb[3].mxu1 }
  0xdf   :  { %v275_v26 = vmax.f32 %v130_v24, 0.0  ;;  %v277_v27 = vmax.f32 %v237_v25, 0.0 }
  0xe0   :  { %302 = vst [vmem:[#allocation2 + $0x20] sm:$0xff] %v274_v22  ;;  %304 = vst [vmem:[#allocation2 + $0x30] sm:$0xff] %v276_v23 }
  0xe1   :  { %303 = vst [vmem:[#allocation2 + $0x28] sm:$0xff] %v275_v26  ;;  %305 = vst [vmem:[#allocation2 + $0x38] sm:$0xff] %v277_v27  ;;  %v134_v28 = vpop.f32.mrb[4].mxu0  ;;  %v241_v29 = vpop.f32.mrb[4].mxu1 }
  0xe2   :  { %v278_v30 = vmax.f32 %v134_v28, 0.0  ;;  %v280_v31 = vmax.f32 %v241_v29, 0.0  ;;  %v136_v32 = vpop.f32.mrb[5].mxu0  ;;  %v243_v33 = vpop.f32.mrb[5].mxu1 }
  0xe3   :  { %v279_v34 = vmax.f32 %v136_v32, 0.0  ;;  %v281_v35 = vmax.f32 %v243_v33, 0.0 }
  0xe4   :  { %306 = vst [vmem:[#allocation2 + $0x40] sm:$0xff] %v278_v30  ;;  %308 = vst [vmem:[#allocation2 + $0x50] sm:$0xff] %v280_v31 }
  0xe5   :  { %307 = vst [vmem:[#allocation2 + $0x48] sm:$0xff] %v279_v34  ;;  %309 = vst [vmem:[#allocation2 + $0x58] sm:$0xff] %v281_v35  ;;  %v140_v36 = vpop.f32.mrb[6].mxu0  ;;  %v247_v37 = vpop.f32.mrb[6].mxu1 }
  0xe6   :  { %v282_v38 = vmax.f32 %v140_v36, 0.0  ;;  %v284_v39 = vmax.f32 %v247_v37, 0.0  ;;  %v142_v40 = vpop.f32.mrb[7].mxu0  ;;  %v249_v41 = vpop.f32.mrb[7].mxu1 }
  0xe7   :  { %v283_v42 = vmax.f32 %v142_v40, 0.0  ;;  %v285_v43 = vmax.f32 %v249_v41, 0.0 }
  0xe8   :  { %310 = vst [vmem:[#allocation2 + $0x60] sm:$0xff] %v282_v38  ;;  %312 = vst [vmem:[#allocation2 + $0x70] sm:$0xff] %v284_v39 }
  0xe9   :  { %311 = vst [vmem:[#allocation2 + $0x68] sm:$0xff] %v283_v42  ;;  %313 = vst [vmem:[#allocation2 + $0x78] sm:$0xff] %v285_v43  ;;  %v146_v44 = vpop.f32.mrb[8].mxu0  ;;  %v253_v45 = vpop.f32.mrb[8].mxu1 }
  0xea   :  { %v286_v46 = vmax.f32 %v146_v44, 0.0  ;;  %v288_v47 = vmax.f32 %v253_v45, 0.0  ;;  %v148_v48 = vpop.f32.mrb[9].mxu0  ;;  %v255_v49 = vpop.f32.mrb[9].mxu1 }
  0xeb   :  { %v287_v50 = vmax.f32 %v148_v48, 0.0  ;;  %v289_v51 = vmax.f32 %v255_v49, 0.0 }
  0xec   :  { %314 = vst [vmem:[#allocation2 + $0x80] sm:$0xff] %v286_v46  ;;  %316 = vst [vmem:[#allocation2 + $0x90] sm:$0xff] %v288_v47 }
  0xed   :  { %315 = vst [vmem:[#allocation2 + $0x88] sm:$0xff] %v287_v50  ;;  %317 = vst [vmem:[#allocation2 + $0x98] sm:$0xff] %v289_v51  ;;  %v152_v52 = vpop.f32.mrb[10].mxu0  ;;  %v259_v53 = vpop.f32.mrb[10].mxu1 }
  0xee   :  { %v290_v54 = vmax.f32 %v152_v52, 0.0  ;;  %v292_v55 = vmax.f32 %v259_v53, 0.0  ;;  %v154_v56 = vpop.f32.mrb[11].mxu0  ;;  %v261_v57 = vpop.f32.mrb[11].mxu1 }
  0xef   :  { %v291_v58 = vmax.f32 %v154_v56, 0.0  ;;  %v293_v59 = vmax.f32 %v261_v57, 0.0 }
  0xf0   :  { %318 = vst [vmem:[#allocation2 + $0xa0] sm:$0xff] %v290_v54  ;;  %320 = vst [vmem:[#allocation2 + $0xb0] sm:$0xff] %v292_v55 }
  0xf1   :  { %319 = vst [vmem:[#allocation2 + $0xa8] sm:$0xff] %v291_v58  ;;  %321 = vst [vmem:[#allocation2 + $0xb8] sm:$0xff] %v293_v59  ;;  %v158_v60 = vpop.f32.mrb[12].mxu0  ;;  %v265_v61 = vpop.f32.mrb[12].mxu1 }
  0xf2   :  { %v294_v62 = vmax.f32 %v158_v60, 0.0  ;;  %v296_v63 = vmax.f32 %v265_v61, 0.0  ;;  %v160_v0 = vpop.f32.mrb[13].mxu0  ;;  %v267_v1 = vpop.f32.mrb[13].mxu1 }
  0xf3   :  { %v295_v2 = vmax.f32 %v160_v0, 0.0  ;;  %v297_v3 = vmax.f32 %v267_v1, 0.0 }
  0xf4   :  { %322 = vst [vmem:[#allocation2 + $0xc0] sm:$0x3] %v294_v62  ;;  %324 = vst [vmem:[#allocation2 + $0xd0] sm:$0x3] %v296_v63 }
  0xf5   :  { %323 = vst [vmem:[#allocation2 + $0xc8] sm:$0x3] %v295_v2  ;;  %325 = vst [vmem:[#allocation2 + $0xd8] sm:$0x3] %v297_v3 }
  0xf6   :  { %377 = shalt.err (!%p374_p4)
}
  0xf7   :  { %s378_s30 = scalar_lea.hbm %s464_s2, 3584 }
  0xf8   :  { %p379_p5 = scmp.ne.s32.totalorder %s464_s2, %s378_s30  ;;  %p382_p6 = scmp.lt.u32.totalorder %s378_s30, %s464_s2 }
  0xfa   :  { %p384_p7 = pnand %p382_p6, %p379_p5 }
  0xfc   :  { %387 = shalt.err (!%p384_p7)
}
  0xfd   :  { %s392_s7 = smov 512   ;;  %s393_s8 = smov 32  }
  0xfe   :  { %337 = dma.vmem_to_hbm [thread:$0]  %s332_s26, 3584, %s464_s2, [#allocation3], %s392_s7, %s392_s7, %s393_s8  }
  0xff   :  { %388 = dma.done.wait [#allocation3], 3584  }
 0x100   :  { %389 = vsyncadd [#allocation3], 4294963712 }
 0x101   :  { %341 = vsyncpa [#allocation3], 1 }

</bundles_post_ra>
